<compile_context>
chip_gen: v7x
topology: tpu7x:2x2x1
jax: 0.10.0
libtpu: 0.0.40
codegen_flags: <defaults>
</compile_context>

<pallas_src>
import functools

import jax
import jax.numpy as jnp
from jax.experimental import pallas as pl
from jax.experimental.pallas import tpu as pltpu

ACT_NONE, ACT_RELU, ACT_LEAKY = 0, 1, 2


def _round_up(x, m):
    return ((x + m - 1) // m) * m


def _cdiv(a, b):
    return (a + b - 1) // b


# ----------------------------------------------------------------------------
# Hardware-aware tile / VMEM configuration
# ----------------------------------------------------------------------------
def _device_kind():
    try:
        return jax.devices()[0].device_kind.lower()
    except Exception:
        return ""


_KIND = _device_kind()
_IS_V5E = ("v5 lite" in _KIND) or ("v5e" in _KIND) or ("v5lite" in _KIND)
_IS_V7 = ("v7" in _KIND) or ("7x" in _KIND)

_TM_MAX = 256                      # 256^2 output tiles on every generation (v5e included)
_TN_MAX = 256
_TK_MAX = 2048                     # prefer a single full-K step when it fits
_VMEM_LIMIT = (48 if _IS_V7 else 96) * 1024 * 1024


def _pick_tn(n):
    if n <= _TN_MAX:
        return n                   # full dim (e.g. Cout=64/128/256)
    for tn in (_TN_MAX, 128):
        if n % tn == 0:
            return tn
    return 128                     # partial edge tile fallback (not hit in this model)


def _pick_tk(k):
    if k <= _TK_MAX:
        return k                   # single K step
    tk = _TK_MAX - (_TK_MAX % 128)
    while tk >= 128:               # largest multiple-of-128 divisor <= _TK_MAX
        if k % tk == 0:
            return tk
        tk -= 128
    for tk in range(min(k, _TK_MAX), 0, -1):
        if k % tk == 0:
            return tk
    return k


# ----------------------------------------------------------------------------
# Pallas kernels
# ----------------------------------------------------------------------------
def _gemm_kernel(*refs, act_id, nk, has_res):
    if has_res:
        a_ref, b_ref, bias_ref, res_ref, o_ref, acc_ref = refs
    else:
        a_ref, b_ref, bias_ref, o_ref, acc_ref = refs
        res_ref = None
    k = pl.program_id(2)

    @pl.when(k == 0)
    def _():
        acc_ref[...] = jnp.zeros_like(acc_ref)

    acc_ref[...] += jnp.dot(a_ref[...], b_ref[...],
                            preferred_element_type=jnp.float32)

    @pl.when(k == nk - 1)
    def _():
        y = acc_ref[...] + bias_ref[...].astype(jnp.float32)
        if res_ref is not None:
            y = y + res_ref[...].astype(jnp.float32)
        if act_id == ACT_RELU:
            y = jnp.maximum(y, 0.0)
        elif act_id == ACT_LEAKY:
            y = jnp.where(y >= 0.0, y, 0.1 * y)
        o_ref[...] = y.astype(o_ref.dtype)


def _conv3x3_tap_kernel(a_ref, w_ref, b_ref, o_ref, acc_ref, *, wo, act_id):
    """3x3 stride-1 conv block: accumulate 9 tap dots from a 3-row-tap stack.

    a_ref: (3, TR, Wp, C) row-tap stack block; w_ref: (Kw, TN) with rows ordered
    (i, j, c); acc/out: (TR*wo, TN).
    """
    tr = a_ref.shape[1]
    c = a_ref.shape[3]
    first = True
    for i in range(3):
        ai = a_ref[i]                              # (TR, Wp, C)
        for j in range(3):
            a2 = ai[:, j:j + wo, :].reshape(tr * wo, c)
            wij = w_ref[(i * 3 + j) * c:(i * 3 + j + 1) * c, :]
            contrib = jnp.dot(a2, wij, preferred_element_type=jnp.float32)
            if first:
                acc_ref[...] = contrib
                first = False
            else:
                acc_ref[...] += contrib
    y = acc_ref[...] + b_ref[...].astype(jnp.float32)
    if act_id == ACT_RELU:
        y = jnp.maximum(y, 0.0)
    elif act_id == ACT_LEAKY:
        y = jnp.where(y >= 0.0, y, 0.1 * y)
    o_ref[...] = y.astype(o_ref.dtype)


def _max9_kernel(*refs):
    o_ref = refs[-1]
    m = refs[0][...]
    for r in refs[1:-1]:
        m = jnp.maximum(m, r[...])
    o_ref[...] = m


def _avgpool_kernel(x_ref, o_ref, *, inv_hw):
    s = jnp.sum(x_ref[...].astype(jnp.float32), axis=1) * inv_hw
    o_ref[...] = s.astype(o_ref.dtype)


# ----------------------------------------------------------------------------
# Pallas wrappers
# ----------------------------------------------------------------------------
def fused_gemm(A, Bw, bias, act_id, residual=None, out_dtype=jnp.bfloat16):
    """O = act(A @ Bw + bias [+ residual]); bf16 operands on the MXU, f32 accumulation."""
    M, K = A.shape
    K2, N = Bw.shape
    assert K == K2, (A.shape, Bw.shape)
    assert bias.shape == (1, N)

    Mp = M
    if M < 16:                                     # tiny-M tail (deep layers / fc head)
        Mp = 16
        A = jnp.pad(A, ((0, Mp - M), (0, 0)))
        if residual is not None:
            residual = jnp.pad(residual, ((0, Mp - M), (0, 0)))

    TM = min(_TM_MAX, Mp)
    TN = _pick_tn(N)
    TK = _pick_tk(K)

    # v7x: make sure both TensorCores get at least one "parallel" output tile.
    if _IS_V7 and _cdiv(Mp, TM) * _cdiv(N, TN) < 2:
        if TN > 128 and N > 128:
            TN = 128
        elif TM > 8:
            TM = max(8, ((TM // 2) // 8) * 8)

    nk = K // TK
    grid = (_cdiv(Mp, TM), _cdiv(N, TN), nk)

    in_specs = [
        pl.BlockSpec((TM, TK), lambda i, j, k: (i, k)),
        pl.BlockSpec((TK, TN), lambda i, j, k: (k, j)),
        pl.BlockSpec((1, TN), lambda i, j, k: (0, j)),
    ]
    args = [A, Bw, bias]
    if residual is not None:
        in_specs.append(pl.BlockSpec((TM, TN), lambda i, j, k: (i, j)))
        args.append(residual)

    kernel = functools.partial(_gemm_kernel, act_id=act_id, nk=nk,
                               has_res=residual is not None)
    out = pl.pallas_call(
        kernel,
        out_shape=jax.ShapeDtypeStruct((Mp, N), out_dtype),
        grid=grid,
        in_specs=in_specs,
        out_specs=pl.BlockSpec((TM, TN), lambda i, j, k: (i, j)),
        scratch_shapes=[pltpu.VMEM((TM, TN), jnp.float32)],
        compiler_params=pltpu.CompilerParams(
            dimension_semantics=("parallel", "parallel", "arbitrary"),
            vmem_limit_bytes=_VMEM_LIMIT,
        ),
    )(*args)
    return out[:M] if Mp != M else out


def _pick_tr(nho, wo):
    """Rows-of-output-rows tile for the 3x3 tap kernel (TR | NHO, (TR*wo)%8==0 or full)."""
    tr = max(1, min(nho, _TM_MAX // max(wo, 1)))
    while tr > 1 and (nho % tr != 0 or (tr < nho and (tr * wo) % 8 != 0)):
        tr -= 1
    if nho % tr != 0:
        return None
    if tr < nho and (tr * wo) % 8 != 0:
        return None
    return tr


def conv3x3_s1_tap(x, wmat, bias, act_id, out_dtype=jnp.bfloat16):
    """3x3 stride-1 pad-1 conv without im2col: 3-row-tap stack + in-kernel tap dots."""
    n, h, w, c = x.shape
    ho, wo, wp = h, w, w + 2
    nho = n * ho
    cout = wmat.shape[1]
    if cout % 128 != 0 and cout > 128:
        return None

    tr = _pick_tr(nho, wo)
    if tr is None:
        return None
    tn = _pick_tn(cout)

    # v7x: keep both TensorCores busy.
    if _IS_V7 and (nho // tr) * _cdiv(cout, tn) < 2:
        if tn > 128 and cout > 128:
            tn = 128
        elif tr > 1:
            cand = tr // 2
            while cand >= 1 and (nho % cand != 0 or (cand * wo) % 8 != 0):
                cand -= 1
            if cand >= 1:
                tr = cand

    tmm = tr * wo
    xp = jnp.pad(x, ((0, 0), (1, 1), (1, 1), (0, 0)))
    stack = jnp.stack([xp[:, i:i + ho, :, :] for i in range(3)], axis=0)
    stack = stack.reshape(3, nho, wp, c)

    kernel = functools.partial(_conv3x3_tap_kernel, wo=wo, act_id=act_id)
    grid = (nho // tr, _cdiv(cout, tn))
    out = pl.pallas_call(
        kernel,
        out_shape=jax.ShapeDtypeStruct((nho * wo, cout), out_dtype),
        grid=grid,
        in_specs=[
            pl.BlockSpec((3, tr, wp, c), lambda m, co: (0, m, 0, 0)),
            pl.BlockSpec((wmat.shape[0], tn), lambda m, co: (0, co)),
            pl.BlockSpec((1, tn), lambda m, co: (0, co)),
        ],
        out_specs=pl.BlockSpec((tmm, tn), lambda m, co: (m, co)),
        scratch_shapes=[pltpu.VMEM((tmm, tn), jnp.float32)],
        compiler_params=pltpu.CompilerParams(
            dimension_semantics=("parallel", "parallel"),
            vmem_limit_bytes=_VMEM_LIMIT,
        ),
    )(stack, wmat, bias)
    return out.reshape(n, ho, wo, cout)


def maxpool_3x3_s2(x):
    n, h, w, c = x.shape
    xp = jnp.pad(x, ((0, 0), (1, 1), (1, 1), (0, 0)), constant_values=-jnp.inf)
    ho = (h + 2 - 3) // 2 + 1
    wo = (w + 2 - 3) // 2 + 1
    m = n * ho * wo
    views = [xp[:, i:i + 2 * ho:2, j:j + 2 * wo:2, :].reshape(m, c)
             for i in range(3) for j in range(3)]
    # lane-dense packing: fold pixel pairs into 128-wide rows (elementwise max is layout-free)
    total = m * c
    if c < 128 and total % 128 == 0:
        rows, cols = total // 128, 128
    else:
        rows, cols = m, c
    views = [v.reshape(rows, cols) for v in views]
    tm = rows if rows <= 1024 else 1024
    spec = pl.BlockSpec((tm, cols), lambda i: (i, 0))
    out = pl.pallas_call(
        _max9_kernel,
        out_shape=jax.ShapeDtypeStruct((rows, cols), x.dtype),
        grid=(_cdiv(rows, tm),),
        in_specs=[spec] * 9,
        out_specs=spec,
        compiler_params=pltpu.CompilerParams(
            dimension_semantics=("parallel",),
            vmem_limit_bytes=_VMEM_LIMIT,
        ),
    )(*views)
    return out.reshape(n, ho, wo, c)


def global_avgpool(x):
    n, h, w, c = x.shape
    hw = h * w
    xr = x.reshape(n, hw, c)
    tc = 256 if c % 256 == 0 else c
    kernel = functools.partial(_avgpool_kernel, inv_hw=1.0 / hw)
    return pl.pallas_call(
        kernel,
        out_shape=jax.ShapeDtypeStruct((n, c), x.dtype),
        grid=(c // tc,),
        in_specs=[pl.BlockSpec((n, hw, tc), lambda j: (0, 0, j))],
        out_specs=pl.BlockSpec((n, tc), lambda j: (0, j)),
        compiler_params=pltpu.CompilerParams(
            dimension_semantics=("parallel",),
            vmem_limit_bytes=_VMEM_LIMIT,
        ),
    )(xr)


# ----------------------------------------------------------------------------
# Glue: im2col (bf16), BN folding, conv dispatch, bottleneck blocks
# ----------------------------------------------------------------------------
def im2col(x, kh, kw, stride, pad, k_rows=None):
    n, h, w, c = x.shape
    xp = jnp.pad(x, ((0, 0), (pad, pad), (pad, pad), (0, 0)))
    ho = (h + 2 * pad - kh) // stride + 1
    wo = (w + 2 * pad - kw) // stride + 1
    cols = [xp[:, i:i + stride * ho:stride, j:j + stride * wo:stride, :]
            for i in range(kh) for j in range(kw)]
    k = kh * kw * c
    if k_rows is None:
        k_rows = _round_up(k, 128)
    assert k_rows >= k
    if k_rows != k:                      # pad K to the (128-aligned) weight row count
        cols.append(jnp.zeros((n, ho, wo, k_rows - k), x.dtype))
    patches = jnp.concatenate(cols, axis=-1)
    return patches.reshape(n * ho * wo, k_rows), (n, ho, wo)


def _fold_conv_bn(w, gamma, beta, mean, var, eps=1e-5, k_multiple=1):
    """Return (weight [Kp, Cout] bf16 with BN scale folded in, bias [1, Cout] f32)."""
    s = gamma / jnp.sqrt(var + eps)
    b = beta - mean * s
    kh, kw, ci, co = w.shape
    k = kh * kw * ci
    wm = w.reshape(k, co) * s[None, :]
    kp = _round_up(k, k_multiple)
    if kp != k:
        wm = jnp.pad(wm, ((0, kp - k), (0, 0)))
    return wm.astype(jnp.bfloat16), b.reshape(1, co).astype(jnp.float32)


_TAP3X3 = {"enabled": True, "verified": False}


def conv2d(x, wmat, bias, kh, kw, stride, pad, act, residual=None,
           out_dtype=jnp.bfloat16):
    n, h, w, c = x.shape
    cout = wmat.shape[1]

    if kh == 1 and kw == 1 and pad == 0:
        if stride == 1:
            ho, wo = h, w
            A = x.reshape(n * h * w, c)                     # zero-copy reshape
        else:
            # TODO(synk): fold the stride into the GEMM A BlockSpec instead of slicing.
            xs = x[:, ::stride, ::stride, :]
            ho, wo = xs.shape[1], xs.shape[2]
            A = xs.reshape(n * ho * wo, c)
        res2d = residual.reshape(n * ho * wo, cout) if residual is not None else None
        y = fused_gemm(A, wmat, bias, act, residual=res2d, out_dtype=out_dtype)
        return y.reshape(n, ho, wo, cout)

    if (kh == 3 and kw == 3 and stride == 1 and pad == 1 and residual is None
            and _TAP3X3["enabled"]):
        try:
            y = conv3x3_s1_tap(x, wmat, bias, act, out_dtype=out_dtype)
            if y is not None:
                if not _TAP3X3["verified"]:
                    jax.block_until_ready(y)
                    _TAP3X3["verified"] = True
                return y
        except Exception:
            # In-kernel tap/reshape path not supported on this backend -> im2col fallback.
            _TAP3X3["enabled"] = False

    A, (n, ho, wo) = im2col(x, kh, kw, stride, pad, k_rows=wmat.shape[0])
    res2d = residual.reshape(n * ho * wo, cout) if residual is not None else None
    y = fused_gemm(A, wmat, bias, act, residual=res2d, out_dtype=out_dtype)
    return y.reshape(n, ho, wo, cout)


def bottleneck(x, bp):
    out = conv2d(x, bp['w1'], bp['b1'], 1, 1, 1, 0, ACT_RELU)
    out = conv2d(out, bp['w2'], bp['b2'], 3, 3, bp['stride'], 1, ACT_RELU)
    if 'wd' in bp:
        identity = conv2d(x, bp['wd'], bp['bd'], 1, 1, bp['stride'], 0, ACT_NONE)
    else:
        identity = x
    # conv3 + BN3 + residual add + ReLU fused into one GEMM epilogue.
    return conv2d(out, bp['w3'], bp['b3'], 1, 1, 1, 0, ACT_RELU, residual=identity)


# ----------------------------------------------------------------------------
# Deterministic synthetic parameters (shapes match torchvision resnet50 + reid head)
# ----------------------------------------------------------------------------
class ParamGen:
    def __init__(self, seed=0):
        self.key = jax.random.PRNGKey(seed)

    def next(self):
        self.key, sub = jax.random.split(self.key)
        return sub

    def conv(self, kh, kw, cin, cout):
        fan_in = kh * kw * cin
        std = (2.0 / fan_in) ** 0.5  # kaiming fan_in
        return std * jax.random.normal(self.next(), (kh, kw, cin, cout), jnp.float32)

    def bn(self, c):
        gamma = 1.0 + 0.02 * jax.random.normal(self.next(), (c,), jnp.float32)
        beta = 0.02 * jax.random.normal(self.next(), (c,), jnp.float32)
        mean = 0.02 * jax.random.normal(self.next(), (c,), jnp.float32)
        var = 1.0 + 0.1 * jnp.abs(jax.random.normal(self.next(), (c,), jnp.float32))
        return (gamma, beta, mean, var)

    def bn1d_kaiming(self, c):
        gamma = 1.0 + 0.02 * jax.random.normal(self.next(), (c,), jnp.float32)
        return (gamma, jnp.zeros((c,), jnp.float32),
                jnp.zeros((c,), jnp.float32), jnp.ones((c,), jnp.float32))

    def linear(self, cin, cout, std):
        return std * jax.random.normal(self.next(), (cin, cout), jnp.float32)


def make_params(class_num=751, seed=0):
    pg = ParamGen(seed)
    params = {}
    params['stem_w'], params['stem_b'] = _fold_conv_bn(
        pg.conv(7, 7, 3, 64), *pg.bn(64), k_multiple=128)

    inplanes = 64
    layers = []
    for planes, blocks, stride in [(64, 3, 1), (128, 4, 2), (256, 6, 2), (512, 3, 2)]:
        stage = []
        for b in range(blocks):
            s = stride if b == 0 else 1
            bp = {'stride': s}
            bp['w1'], bp['b1'] = _fold_conv_bn(pg.conv(1, 1, inplanes, planes), *pg.bn(planes))
            bp['w2'], bp['b2'] = _fold_conv_bn(pg.conv(3, 3, planes, planes),
                                               *pg.bn(planes), k_multiple=128)
            bp['w3'], bp['b3'] = _fold_conv_bn(pg.conv(1, 1, planes, planes * 4),
                                               *pg.bn(planes * 4))
            if s != 1 or inplanes != planes * 4:
                bp['wd'], bp['bd'] = _fold_conv_bn(pg.conv(1, 1, inplanes, planes * 4),
                                                   *pg.bn(planes * 4))
            inplanes = planes * 4
            stage.append(bp)
        layers.append(stage)
    params['layers'] = layers

    # model.fc = Linear(2048,512) + BatchNorm1d(512) + LeakyReLU(0.1) + Dropout(0.5)
    fc_w = pg.linear(2048, 512, std=(2.0 / 512) ** 0.5)   # kaiming fan_out
    fc_b = jnp.zeros((512,), jnp.float32)
    g, be, mu, var = pg.bn1d_kaiming(512)
    s = g / jnp.sqrt(var + 1e-5)
    b = be - mu * s
    params['fc_w'] = (fc_w * s[None, :]).astype(jnp.bfloat16)
    params['fc_b'] = (fc_b * s + b).reshape(1, 512).astype(jnp.float32)

    # classifier = Linear(512, class_num), weight ~ N(0, 0.001), bias 0.
    # N padded to a lane-dense multiple of 128 (751 -> 768); sliced back after the GEMM.
    cls_pad = _round_up(class_num, 128)
    cw = pg.linear(512, class_num, std=0.001)
    cw = jnp.pad(cw, ((0, 0), (0, cls_pad - class_num)))
    params['cls_w'] = cw.astype(jnp.bfloat16)
    params['cls_b'] = jnp.zeros((1, cls_pad), jnp.float32)
    params['class_num'] = class_num
    return params


# ----------------------------------------------------------------------------
# Forward pass (inference-mode semantics)
# ----------------------------------------------------------------------------
def reid_resnet50_forward(x_nchw, params):
    x = jnp.transpose(x_nchw, (0, 2, 3, 1)).astype(jnp.bfloat16)   # NCHW -> NHWC bf16
    x = conv2d(x, params['stem_w'], params['stem_b'], 7, 7, 2, 3, ACT_RELU)
    x = maxpool_3x3_s2(x)
    for stage in params['layers']:
        for bp in stage:
            x = bottleneck(x, bp)
    feat = global_avgpool(x)                                       # (N, 2048)

    # fc head: Linear -> BatchNorm1d (folded into weights) -> LeakyReLU(0.1) -> Dropout
    x = fused_gemm(feat, params['fc_w'], params['fc_b'], ACT_LEAKY)
    # TODO(synk): Dropout(p=0.5) is eval-mode identity here (no in-kernel RNG applied).

    # classifier: Linear(512, class_num) on a 768-wide padded output, sliced back to 751.
    logits = fused_gemm(x, params['cls_w'], params['cls_b'], ACT_NONE,
                        out_dtype=jnp.float32)
    return logits[:, :params['class_num']]


if __name__ == "__main__":
    class_num = 751
    params = make_params(class_num=class_num, seed=0)

    key = jax.random.PRNGKey(0)
    # Small spatial input (32x32) so ResNet-50's stride-32 backbone ends at 1x1.
    x = jax.random.normal(key, (2, 3, 32, 32), jnp.float32)

    logits = reid_resnet50_forward(x, params)
    logits = jax.block_until_ready(logits)

    assert logits.shape == (2, class_num), logits.shape
    assert bool(jnp.all(jnp.isfinite(logits)))
    print("KERNEL_OK")
</pallas_src>

<mosaic_0001>
module attributes {stable_mosaic.version = 11 : i64} {
  func.func @_gemm_kernel(%arg0: i32, %arg1: i32, %arg2: i32, %arg3: memref<256x256xbf16, #tpu.memory_space<vmem>>, %arg4: memref<256x64xbf16, #tpu.memory_space<vmem>>, %arg5: memref<1x64xf32, #tpu.memory_space<vmem>>, %arg6: memref<256x64xbf16, #tpu.memory_space<vmem>>, %arg7: memref<256x64xf32, #tpu.memory_space<vmem>>) attributes {dimension_semantics = [#tpu.dimension_semantics<parallel>, #tpu.dimension_semantics<parallel>, #tpu.dimension_semantics<arbitrary>], iteration_bounds = array<i64: 2, 1, 1>, scalar_prefetch = 0 : i64, scratch_operands = 1 : i64, tpu.core_type = #tpu.core_type<tc>, window_params = [{transform_indices = @transform_0, window_bounds = array<i64: 256, 256>}, {transform_indices = @transform_1, window_bounds = array<i64: 256, 64>}, {transform_indices = @transform_2, window_bounds = array<i64: 1, 64>}, {transform_indices = @transform_3, window_bounds = array<i64: 256, 64>}]} {
    %c0_i32 = arith.constant 0 : i32
    %0 = arith.cmpi eq, %arg2, %c0_i32 : i32
    %1 = arith.extui %0 : i1 to i32
    %c0_i32_0 = arith.constant 0 : i32
    %2 = arith.cmpi ne, %1, %c0_i32_0 : i32
    scf.if %2 {
      %cst_10 = arith.constant 0.000000e+00 : f32
      %12 = vector.broadcast %cst_10 : f32 to vector<256x64xf32>
      %c0_11 = arith.constant 0 : index
      %c0_12 = arith.constant 0 : index
      %13 = vector.load %arg7[%c0_11, %c0_12] : memref<256x64xf32, #tpu.memory_space<vmem>>, vector<256x64xf32>
      tpu.vector_store %arg7[%c0_11, %c0_12], %12 {strides = array<i32>} : memref<256x64xf32, #tpu.memory_space<vmem>>, vector<256x64xf32>,
    } else {
    }
    %c0 = arith.constant 0 : index
    %c0_1 = arith.constant 0 : index
    %3 = vector.load %arg7[%c0, %c0_1] : memref<256x64xf32, #tpu.memory_space<vmem>>, vector<256x64xf32>
    %c0_2 = arith.constant 0 : index
    %c0_3 = arith.constant 0 : index
    %4 = vector.load %arg3[%c0_2, %c0_3] : memref<256x256xbf16, #tpu.memory_space<vmem>>, vector<256x256xbf16>
    %c0_4 = arith.constant 0 : index
    %c0_5 = arith.constant 0 : index
    %5 = vector.load %arg4[%c0_4, %c0_5] : memref<256x64xbf16, #tpu.memory_space<vmem>>, vector<256x64xbf16>
    %cst = arith.constant dense<0.000000e+00> : vector<256x64xf32>
    %6 = tpu.matmul %4, %5, %cst {dimension_numbers = #tpu.dot_dimension_numbers<[1], [0], [0], [1], [0, 0, 1, 1], [], []>} : vector<256x256xbf16>, vector<256x64xbf16>, vector<256x64xf32> -> vector<256x64xf32>
    %7 = arith.addf %3, %6 : vector<256x64xf32>
    %c0_6 = arith.constant 0 : index
    %c0_7 = arith.constant 0 : index
    %8 = vector.load %arg7[%c0_6, %c0_7] : memref<256x64xf32, #tpu.memory_space<vmem>>, vector<256x64xf32>
    tpu.vector_store %arg7[%c0_6, %c0_7], %7 {strides = array<i32>} : memref<256x64xf32, #tpu.memory_space<vmem>>, vector<256x64xf32>,
    %c0_i32_8 = arith.constant 0 : i32
    %9 = arith.cmpi eq, %arg2, %c0_i32_8 : i32
    %10 = arith.extui %9 : i1 to i32
    %c0_i32_9 = arith.constant 0 : i32
    %11 = arith.cmpi ne, %10, %c0_i32_9 : i32
    scf.if %11 {
      %c0_10 = arith.constant 0 : index
      %c0_11 = arith.constant 0 : index
      %12 = vector.load %arg7[%c0_10, %c0_11] : memref<256x64xf32, #tpu.memory_space<vmem>>, vector<256x64xf32>
      %c0_12 = arith.constant 0 : index
      %c0_13 = arith.constant 0 : index
      %13 = vector.load %arg5[%c0_12, %c0_13] : memref<1x64xf32, #tpu.memory_space<vmem>>, vector<1x64xf32>
      %14 = vector.broadcast %13 : vector<1x64xf32> to vector<256x64xf32>
      %15 = arith.addf %12, %14 : vector<256x64xf32>
      %cst_14 = arith.constant 0.000000e+00 : f32
      %16 = vector.broadcast %cst_14 : f32 to vector<256x64xf32>
      %17 = arith.maximumf %15, %16 : vector<256x64xf32>
      %18 = arith.truncf %17 : vector<256x64xf32> to vector<256x64xbf16>
      %c0_15 = arith.constant 0 : index
      %c0_16 = arith.constant 0 : index
      %19 = vector.load %arg6[%c0_15, %c0_16] : memref<256x64xbf16, #tpu.memory_space<vmem>>, vector<256x64xbf16>
      tpu.vector_store %arg6[%c0_15, %c0_16], %18 {strides = array<i32>} : memref<256x64xbf16, #tpu.memory_space<vmem>>, vector<256x64xbf16>,
    } else {
    }
    return
  }
  func.func @transform_0(%arg0: i32, %arg1: i32, %arg2: i32) -> (i32, i32) {
    %c0_i32 = arith.constant 0 : i32
    return %arg0, %arg2 : i32, i32
  }
  func.func @transform_1(%arg0: i32, %arg1: i32, %arg2: i32) -> (i32, i32) {
    %c0_i32 = arith.constant 0 : i32
    return %arg2, %arg1 : i32, i32
  }
  func.func @transform_2(%arg0: i32, %arg1: i32, %arg2: i32) -> (i32, i32) {
    %c0_i32 = arith.constant 0 : i32
    %c0_i32_0 = arith.constant 0 : i32
    return %c0_i32, %arg1 : i32, i32
  }
  func.func @transform_3(%arg0: i32, %arg1: i32, %arg2: i32) -> (i32, i32) {
    %c0_i32 = arith.constant 0 : i32
    return %arg0, %arg1 : i32, i32
  }
}

</mosaic_0001>

<bundles_post_ra>
// kernel: tpu_custom_call.1
= control target key start
LH: loop header
LB: loop body
LE: loop exit
PB: predicated region body
PF: predicated region fallthrough
CT: control target
= control target key end

     0   :  { %8 = vsyncpa [#allocation4], 0  ;;  %s2357_s0 = inlined_call_operand.hbm [shape: bf16[512,256], index: 0, kind: input, shape index: {}]   ;;  %s2358_s1 = inlined_call_operand.hbm [shape: bf16[256,64], index: 1, kind: input, shape index: {}]   ;;  %s2359_s2 = inlined_call_operand.hbm [shape: f32[1,64], index: 2, kind: input, shape index: {}]   ;;  %s2360_s3 = inlined_call_operand.hbm [shape: bf16[512,64], index: 3, kind: output, shape index: {}]  }
   0x1   :  { %10 = vsyncpa [#allocation4 + $0x1], 0 }
   0x2   :  { %11 = vsyncpa [#allocation7], 0 }
   0x3   :  { %12 = vsyncpa [#allocation5], 0 }
   0x4   :  { %14 = vsyncpa [#allocation5 + $0x1], 0  ;;  %s1899_s12 = smov 0   ;;  %s1901_s13 = smov 0  }
   0x5   :  { %s1903_s14 = smov 0   ;;  %s1905_s15 = smov 0  }
   0x6   :  { %s1907_s16 = smov 0   ;;  %s1909_s17 = smov 0  }
   0x7 LB: > { %s1276_s18 = sadd.s32 4294967295, %s1866_s17   ;;  %s1277_s19 = sadd.s32 4294967294, %s1866_s17   ;;  %s1866_s17 = sphi %s1909_s17, %s20_s17   ;;  %s1862_s16 = sphi %s1907_s16, %s2382_s16   ;;  %s1858_s15 = sphi %s1905_s15, %s2381_s15   ;;  %s1854_s14 = sphi %s1903_s14, %s2380_s14   ;;  %s1850_s13 = sphi %s1901_s13, %s2379_s13   ;;  %s1846_s12 = sphi %s1899_s12, %s2378_s12  }
   0x8   : > { %p61_p0 = scmp.ne.s32.totalorder %s1850_s13, %s1846_s12  ;;  %p1933_p1 = scmp.eq.s32.totalorder %s1276_s18, 0 }
   0x9   : > { %p1937_p2 = scmp.eq.s32.totalorder %s1276_s18, 1  ;;  %p147_p3 = scmp.eq.s32.totalorder %s1277_s19, 1 }
   0xa   : > { %s2365_s20 = scalar_select %p1933_p1, 1, 0 }
   0xb   : > { %p1943_p4 = por %p1933_p1, %p61_p0  ;;  %p1278_p5 = scmp.ge.s32.totalorder %s1866_s17, 1 }
   0xc   : > { %p1948_p6 = por %p147_p3, %p61_p0  ;;  %p154_p7 = scmp.lt.s32.totalorder %s1866_s17, 3 }
   0xd   : > { %s2367_s22 = scalar_select %p1943_p4, 1, 0 }
   0xe   : > { %s2368_s23 = scalar_select %p1948_p6, 1, 0 }
   0xf   : > { %p1953_p8 = pnand %p1278_p5, %p154_p7  ;;  %s1868_s25 = smov [#allocation6]  }
  0x10   : > { %s170_s26 = sshll.u32 %s1868_s25, 4  ;;  %s1869_s28 = smov [#allocation8]   ;;  %s1957_s26 = int_to_ptr.vmem [resolvable:$true] %s170_s26 }
  0x11   : > { %p1552_p9 = pneg %p1953_p8  ;;  %s186_s29 = sshll.u32 %s1869_s28, 4  ;;  %s1968_s29 = int_to_ptr.vmem [resolvable:$true] %s186_s29 }
  0x12   : > { %s1694_s5 = scalar_lea.hbm %s2358_s1, 2048 }
  0x13   : > { %p1964_p11 = pnand %p1552_p9, %p1933_p1  ;;  %p1695_p12 = scmp.ne.s32.totalorder %s2358_s1, %s1694_s5 }
  0x14   : > { %p1701_p5 = scmp.lt.u32.totalorder %s1694_s5, %s2358_s1 }
  0x15   : > { %p1696_p13 = pneg %p1964_p11 }
  0x17   : > { %p1697_p0 = pnand %p1696_p13, %p1695_p12 }
  0x19   : > { %p1698_p3 = pneg %p1697_p0 }
  0x1b   : > { %p1703_p7 = pnand %p1701_p5, %p1698_p3 }
  0x1d   : > { %1706 = shalt.err (!%p1703_p7)
}
  0x1e   : > { %s1707_s10 = scalar_lea.vmem %s1957_s26, 2048  ;;  %p1715_p1 = scmp.lt.s32.totalorder %s1957_s26, %s1957_s26 }
  0x1f   : > { %p1708_p9 = scmp.ne.s32.totalorder %s1957_s26, %s1707_s10  ;;  %p1716_p12 = scmp.lt.s32.totalorder %s1707_s10, %s1707_s10 }
  0x21   : > { %p1710_p10 = pnand %p1708_p9, %p1696_p13  ;;  %p1717_p0 = por %p1716_p12, %p1715_p1 }
  0x23   : > { %p1711_p6 = pneg %p1710_p10 }
  0x25   : > { %p1718_p4 = pnand %p1717_p0, %p1711_p6 }
  0x27   : > { %1721 = shalt.err (!%p1718_p4)
}
  0x28   : > { %s1870_s11 = smov 64   ;;  %s1871_s18 = smov 4  }
  0x29   : > { %1555 = dma.hbm_to_vmem [thread:$0]  (!%p1964_p11), %s2358_s1, 2048, %s1957_s26, [#allocation7], %s1870_s11, %s1870_s11, %s1871_s18  }
  0x2a   : > { %s1722_s4 = scalar_lea.hbm %s2359_s2, 16 }
  0x2b   : > { %p1723_p1 = scmp.ne.s32.totalorder %s2359_s2, %s1722_s4  ;;  %p1729_p10 = scmp.lt.u32.totalorder %s1722_s4, %s2359_s2 }
  0x2d   : > { %p1725_p4 = pnand %p1723_p1, %p1696_p13 }
  0x2f   : > { %p1726_p6 = pneg %p1725_p4 }
  0x31   : > { %p1731_p3 = pnand %p1729_p10, %p1726_p6 }
  0x33   : > { %1734 = shalt.err (!%p1731_p3)
}
  0x34   : > { %s1735_s26 = scalar_lea.vmem %s1968_s29, 16  ;;  %s1742_s9 = scalar_lea.vmem %s1968_s29, 32 }
  0x35   : > { %p1736_p5 = scmp.ne.s32.totalorder %s1968_s29, %s1735_s26  ;;  %p1743_p12 = scmp.lt.s32.totalorder %s1968_s29, %s1968_s29 }
  0x36   : > { %p1744_p0 = scmp.lt.s32.totalorder %s1742_s9, %s1735_s26 }
  0x37   : > { %p1738_p7 = pnand %p1736_p5, %p1696_p13 }
  0x38   : > { %p1745_p1 = por %p1744_p0, %p1743_p12 }
  0x39   : > { %p1739_p9 = pneg %p1738_p7 }
  0x3b   : > { %p1746_p4 = pnand %p1745_p1, %p1739_p9 }
  0x3d   : > { %1749 = shalt.err (!%p1746_p4)
}
  0x3e   : > { %1558 = dma.hbm_to_vmem [thread:$0]  (!%p1964_p11), %s2359_s2, 16, %s1968_s29, [#allocation7]  }
  0x3f   : > { %s39_s18 = sadd.s32 1, %s1862_s16  ;;  %s48_s19 = sadd.s32 1, %s1854_s14 }
  0x40   : > { %p41_p13 = scmp.ge.s32.totalorder %s39_s18, 2  ;;  %p55_p6 = scmp.ne.s32.totalorder %s1854_s14, %s1850_s13 }
  0x41   : > { %p56_p10 = scmp.eq.s32.totalorder %s1866_s17, 0  ;;  %p1569_p3 = scmp.lt.s32.totalorder %s1866_s17, 2 }
  0x42   : > { %s2384_s18 = smov (%p41_p13, %s39_s18), 0  ;;  %p2033_p7 = por %p1937_p2, %p55_p6 }
  0x43   : > { %p57_p5 = por %p56_p10, %p55_p6  ;;  %s43_s25 = ssub.s32 %s1862_s16, %s2384_s18 }
  0x44   : > { %s2371_s27 = scalar_select %p2033_p7, 1, 0 }
  0x45   : > { %s197_s28 = sand.u32 1, %s1854_s14   ;;  %p46_p9 = scmp.eq.s32.totalorder %s43_s25, 0 }
  0x46   : > { %s1282_s29 = sshll.u32 %s197_s28, 8  ;;  %s1378_s30 = sshll.u32 %s1862_s16, 12 }
  0x47   : > { %s2042_s4 = scalar_select %p46_p9, %s1854_s14, %s48_s19  }
  0x48   : > { %s2047_s7 = scalar_lea.hbm %s2357_s0, %s1378_s30  ;;  %s201_s21 = scalar_lea.vmem [#allocation3], %s1282_s29 }
  0x49   : > { %s211_s8 = sshll.u32 %s201_s21, 4  ;;  %p2051_p2 = pnand %p1569_p3, %p57_p5  ;;  %s2055_s8 = int_to_ptr.vmem [resolvable:$true] %s211_s8 }
  0x4a   : > { %s2057_s9 = scalar_lea.sflag [#allocation4], %s197_s28  ;;  %s1750_s10 = scalar_lea.hbm %s2047_s7, 4096 }
  0x4b   : > { %p1751_p11 = scmp.ne.s32.totalorder %s2047_s7, %s1750_s10  ;;  %p1752_p12 = pneg %p2051_p2 }
  0x4c   : > { %s1755_s25 = scalar_lea.hbm %s2357_s0, 8192  ;;  %p1756_p4 = scmp.lt.u32.totalorder %s2047_s7, %s2357_s0 }
  0x4d   : > { %p1753_p0 = pnand %p1752_p12, %p1751_p11  ;;  %p1757_p13 = scmp.lt.u32.totalorder %s1755_s25, %s1750_s10 }
  0x4e   : > { %p1759_p10 = scmp.lt.u32.totalorder %s1750_s10, %s2047_s7 }
  0x4f   : > { %p1754_p1 = pneg %p1753_p0  ;;  %p1758_p6 = por %p1757_p13, %p1756_p4 }
  0x51   : > { %p1760_p3 = por %p1759_p10, %p1758_p6 }
  0x53   : > { %p1761_p5 = pnand %p1760_p3, %p1754_p1 }
  0x55   : > { %1764 = shalt.err (!%p1761_p5)
}
  0x56   : > { %s1765_s28 = scalar_lea.vmem %s2055_s8, 4096  ;;  %s1872_s5 = smov [#allocation3]  }
  0x57   : > { %p1766_p9 = scmp.ne.s32.totalorder %s2055_s8, %s1765_s28  ;;  %s1770_s6 = sshll.u32 %s1872_s5, 4  ;;  %s1771_s6 = int_to_ptr.vmem [resolvable:$false] %s1770_s6 }
  0x58   : > { %s1772_s21 = scalar_lea.vmem %s1771_s6, 8192  ;;  %p1773_p7 = scmp.lt.s32.totalorder %s2055_s8, %s1771_s6 }
  0x59   : > { %p1768_p11 = pnand %p1766_p9, %p1752_p12  ;;  %p1774_p4 = scmp.lt.s32.totalorder %s1772_s21, %s1765_s28 }
  0x5b   : > { %p1769_p0 = pneg %p1768_p11  ;;  %p1775_p13 = por %p1774_p4, %p1773_p7 }
  0x5d   : > { %p1776_p6 = pnand %p1775_p13, %p1769_p0 }
  0x5f   : > { %1779 = shalt.err (!%p1776_p6)
}
  0x60   : > { %s1873_s10 = smov 128   ;;  %s1874_s11 = smov 8  }
  0x61   : > { %1562 = dma.hbm_to_vmem [thread:$0]  (!%p2051_p2), %s2047_s7, 4096, %s2055_s8, %s2057_s9, %s1873_s10, %s1873_s10, %s1874_s11  }
  0x62   : > { %223 = sbr.rel (%p1953_p8) target bundleno = 449 (0x1c1), region = 32  ;;  %s2088_s19 = sand.u32 (!%p1953_p8), 1, %s1850_s13  }
  0x63   : > { %s1287_s25 = sshll.u32 (!%p1953_p8), %s2088_s19, 8  ;;  %s226_s29 = scalar_lea.sflag (!%p1953_p8), [#allocation4], %s2088_s19 }
  0x64   : > { %s2092_s30 = scalar_lea.vmem (!%p1953_p8), [#allocation3], %s1287_s25  ;;  %p2373_p7 = scmp.ne.s32.totalorder (!%p1953_p8), %s2367_s22, 0 }
  0x69   : > { %1833 = dma.done.wait (%p2373_p7), %s226_s29, 4096  }
  0x6a   : > { %1835 = vsyncadd (%p2373_p7), %s226_s29, 4294963200  ;;  %p2374_p2 = scmp.ne.s32.totalorder %s2365_s20, 0 }
  0x6c   : > { %1837 = dma.done.wait (%p2374_p2), [#allocation7], 2064  }
  0x6d   : > { %1839 = vsyncadd (%p2374_p2), [#allocation7], 4294965232  ;;  %v1630_v0 = vld [vmem:[#allocation6 + $0x40] sm:$0xff]   ;;  %v1632_v2 = vld [vmem:[#allocation6 + $0x48] sm:$0xff]   ;;  %vm269_vm0 = vcmask 523264   ;;  %v1875_v48 = vmov 0.0  }
  0x6e   : > { %v1631_v1 = vld [vmem:[#allocation6] sm:$0xff]   ;;  %1412 = vmatprep.subr.bf16.mxu0 %v1630_v0  ;;  %1524 = vmatprep.subr.bf16.mxu1 %v1630_v0  ;;  %v1633_v3 = vld [vmem:[#allocation6 + $0x8] sm:$0xff]   ;;  %v1634_v4 = vld [vmem:[#allocation6 + $0x50] sm:$0xff]   ;;  %270 = vst.msk [vmem:[#allocation2] sm:$0xff] %vm269_vm0, %v1875_v48  ;;  %s1290_s20 = sshll.u32 %s2088_s19, 7  ;;  %vm1114_vm1 = vcmask 519168  }
  0x6f   : > { %1413 = vmatpush3.bf16.msra.mxu0 %v1631_v1  ;;  %1532 = vmatpush3.bf16.msra.mxu1 %v1631_v1  ;;  %v1635_v5 = vld [vmem:[#allocation6 + $0x10] sm:$0xff]   ;;  %v1636_v6 = vld [vmem:[#allocation6 + $0x58] sm:$0xff]   ;;  %v1638_v8 = vld [vmem:[#allocation6 + $0x60] sm:$0xff]   ;;  %271 = vst.msk [vmem:[#allocation2 + $0x8] sm:$0xff] %vm269_vm0, %v1875_v48  ;;  %s2183_s22 = scalar_lea.vmem [#allocation9], %s1290_s20  ;;  %s1411_s24 = sshll.u32 %s1858_s15, 11 }
  0x70   : > { %1414 = vmatprep.subr.bf16.mxu0 %v1632_v2  ;;  %1525 = vmatprep.subr.bf16.mxu1 %v1632_v2  ;;  %v1637_v7 = vld [vmem:[#allocation6 + $0x18] sm:$0xff]   ;;  %v1639_v9 = vld [vmem:[#allocation6 + $0x20] sm:$0xff]   ;;  %v1640_v10 = vld [vmem:[#allocation6 + $0x68] sm:$0xff]   ;;  %272 = vst.msk [vmem:[#allocation2 + $0x10] sm:$0xff] %vm269_vm0, %v1875_v48  ;;  %s1162_s7 = sshll.u32 %s2183_s22, 4  ;;  %s2298_s9 = scalar_lea.hbm %s2360_s3, %s1411_s24  ;;  %s2300_s7 = int_to_ptr.vmem [resolvable:$true] %s1162_s7 }
  0x71   : > { %v1648_v11 = vld [vmem:[%s2092_s30 + $0x4] ss:$8 sps:$4 sm:$0xff]   ;;  %v1642_v14 = vld [vmem:[#allocation6 + $0x70] sm:$0xff]   ;;  %v1644_v16 = vld [vmem:[#allocation6 + $0x78] sm:$0xff]   ;;  %273 = vst.msk [vmem:[#allocation2 + $0x18] sm:$0xff] %vm269_vm0, %v1875_v48  ;;  %s1148_s15 = scalar_lea.sflag [#allocation5], %s2088_s19 }
  0x72   : > { %v1651_v12 = vld [vmem:[%s2092_s30 + $0x84] ss:$8 sps:$4 sm:$0xff]   ;;  %686 = vmatprep.mubr.bf16.mxu0 %v1648_v11  ;;  %v1643_v15 = vld [vmem:[#allocation6 + $0x30] sm:$0xff]   ;;  %v1645_v17 = vld [vmem:[#allocation6 + $0x38] sm:$0xff]   ;;  %274 = vst.msk [vmem:[#allocation2 + $0x20] sm:$0xff] %vm269_vm0, %v1875_v48  ;;  %s1780_s28 = scalar_lea.vmem %s2300_s7, 2048 }
  0x73   : > { %1415 = vmatpush3.bf16.msra.mxu0 %v1633_v3  ;;  %1533 = vmatpush3.bf16.msra.mxu1 %v1633_v3  ;;  %v1641_v13 = vld [vmem:[#allocation6 + $0x28] sm:$0xff]   ;;  %v1652_v20 = vld [vmem:[%s2092_s30 + $0x14] ss:$8 sps:$4 sm:$0xff]   ;;  %v1656_v22 = vld [vmem:[%s2092_s30 + $0x10] ss:$8 sps:$4 sm:$0xff]   ;;  %275 = vst.msk [vmem:[#allocation2 + $0x28] sm:$0xff] %vm269_vm0, %v1875_v48  ;;  %p1781_p8 = scmp.ne.s32.totalorder %s2300_s7, %s1780_s28 }
  0x74   : > { %1416 = vmatprep.subr.bf16.mxu0 %v1634_v4  ;;  %1526 = vmatprep.subr.bf16.mxu1 %v1634_v4  ;;  %v1646_v18 = vld [vmem:[%s2092_s30] ss:$8 sps:$4 sm:$0xff]   ;;  %v1654_v21 = vld [vmem:[%s2092_s30 + $0x94] ss:$8 sps:$4 sm:$0xff]   ;;  %v1657_v23 = vld [vmem:[%s2092_s30 + $0x90] ss:$8 sps:$4 sm:$0xff]  }
  0x75   : > { %750 = vmatprep.mubr.bf16.mxu1 %v1651_v12  ;;  %v1649_v19 = vld [vmem:[%s2092_s30 + $0x80] ss:$8 sps:$4 sm:$0xff]   ;;  %v1658_v24 = vld [vmem:[%s2092_s30 + $0x24] ss:$8 sps:$4 sm:$0xff]   ;;  %v1664_v28 = vld [vmem:[%s2092_s30 + $0x34] ss:$8 sps:$4 sm:$0xff]  }
  0x76   : > { %v1660_v25 = vld [vmem:[%s2092_s30 + $0xa4] ss:$8 sps:$4 sm:$0xff]   ;;  %v1662_v26 = vld [vmem:[%s2092_s30 + $0x20] ss:$8 sps:$4 sm:$0xff]   ;;  %v1666_v29 = vld [vmem:[%s2092_s30 + $0xb4] ss:$8 sps:$4 sm:$0xff]  }
  0x77   : > { %1417 = vmatpush3.bf16.msra.mxu0 %v1635_v5  ;;  %1534 = vmatpush3.bf16.msra.mxu1 %v1635_v5  ;;  %v1663_v27 = vld [vmem:[%s2092_s30 + $0xa0] ss:$8 sps:$4 sm:$0xff]   ;;  %v1668_v30 = vld [vmem:[%s2092_s30 + $0x30] ss:$8 sps:$4 sm:$0xff]   ;;  %v1670_v32 = vld [vmem:[%s2092_s30 + $0x44] ss:$8 sps:$4 sm:$0xff]  }
  0x78   : > { %1418 = vmatprep.subr.bf16.mxu0 %v1636_v6  ;;  %1527 = vmatprep.subr.bf16.mxu1 %v1636_v6  ;;  %v1669_v31 = vld [vmem:[%s2092_s30 + $0xb0] ss:$8 sps:$4 sm:$0xff]   ;;  %v1672_v33 = vld [vmem:[%s2092_s30 + $0xc4] ss:$8 sps:$4 sm:$0xff]   ;;  %v1674_v34 = vld [vmem:[%s2092_s30 + $0x40] ss:$8 sps:$4 sm:$0xff]  }
  0x79   : > { %v1675_v35 = vld [vmem:[%s2092_s30 + $0xc0] ss:$8 sps:$4 sm:$0xff]   ;;  %v1676_v36 = vld [vmem:[%s2092_s30 + $0x54] ss:$8 sps:$4 sm:$0xff]   ;;  %v1680_v38 = vld [vmem:[%s2092_s30 + $0x50] ss:$8 sps:$4 sm:$0xff]  }
  0x7a   : > { %v1678_v37 = vld [vmem:[%s2092_s30 + $0xd4] ss:$8 sps:$4 sm:$0xff]   ;;  %v1681_v39 = vld [vmem:[%s2092_s30 + $0xd0] ss:$8 sps:$4 sm:$0xff]   ;;  %v1682_v40 = vld [vmem:[%s2092_s30 + $0x64] ss:$8 sps:$4 sm:$0xff]  }
  0x7b   : > { %1419 = vmatpush3.bf16.msra.mxu0 %v1637_v7  ;;  %1535 = vmatpush3.bf16.msra.mxu1 %v1637_v7  ;;  %v1684_v41 = vld [vmem:[%s2092_s30 + $0xe4] ss:$8 sps:$4 sm:$0xff]   ;;  %v1686_v42 = vld [vmem:[%s2092_s30 + $0x60] ss:$8 sps:$4 sm:$0xff]   ;;  %v1688_v44 = vld [vmem:[%s2092_s30 + $0x74] ss:$8 sps:$4 sm:$0xff]  }
  0x7c   : > { %1420 = vmatprep.subr.bf16.mxu0 %v1638_v8  ;;  %1528 = vmatprep.subr.bf16.mxu1 %v1638_v8  ;;  %v1687_v43 = vld [vmem:[%s2092_s30 + $0xe0] ss:$8 sps:$4 sm:$0xff]   ;;  %v1690_v45 = vld [vmem:[%s2092_s30 + $0xf4] ss:$8 sps:$4 sm:$0xff]   ;;  %v1692_v46 = vld [vmem:[%s2092_s30 + $0x70] ss:$8 sps:$4 sm:$0xff]  }
  0x7d   : > { %v1693_v47 = vld [vmem:[%s2092_s30 + $0xf0] ss:$8 sps:$4 sm:$0xff]   ;;  %276 = vst.msk [vmem:[#allocation2 + $0x30] sm:$0xff] %vm269_vm0, %v1875_v48  ;;  %277 = vst.msk [vmem:[#allocation2 + $0x38] sm:$0xff] %vm269_vm0, %v1875_v48  ;;  %v302_v51 = vld [vmem:[#allocation2] sm:$0xff]  ;;  %p2375_p12 = scmp.ne.s32.totalorder %s2371_s27, 0 }
  0x7e   : > { %278 = vst.msk [vmem:[#allocation2 + $0x40] sm:$0xff] %vm269_vm0, %v1875_v48  ;;  %279 = vst.msk [vmem:[#allocation2 + $0x48] sm:$0xff] %vm269_vm0, %v1875_v48  ;;  %v303_v59 = vld [vmem:[#allocation2 + $0x8] sm:$0xff]  ;;  %v304_v7 = vld [vmem:[#allocation2 + $0x10] sm:$0xff]  ;;  %s1876_s5 = smov [#allocation9]  }
  0x7f   : > { %1421 = vmatpush3.bf16.msra.mxu0 %v1639_v9  ;;  %1536 = vmatpush3.bf16.msra.mxu1 %v1639_v9  ;;  %280 = vst.msk [vmem:[#allocation2 + $0x50] sm:$0xff] %vm269_vm0, %v1875_v48  ;;  %281 = vst.msk [vmem:[#allocation2 + $0x58] sm:$0xff] %vm269_vm0, %v1875_v48  ;;  %p1782_p1 = pnand %p1781_p8, %p2375_p12  ;;  %s1784_s6 = sshll.u32 %s1876_s5, 4  ;;  %s1785_s6 = int_to_ptr.vmem [resolvable:$false] %s1784_s6 }
  0x80   : > { %1422 = vmatprep.subr.bf16.mxu0 %v1640_v10  ;;  %1529 = vmatprep.subr.bf16.mxu1 %v1640_v10  ;;  %282 = vst.msk [vmem:[#allocation2 + $0x60] sm:$0xff] %vm269_vm0, %v1875_v48  ;;  %283 = vst.msk [vmem:[#allocation2 + $0x68] sm:$0xff] %vm269_vm0, %v1875_v48  ;;  %s1786_s21 = scalar_lea.vmem %s1785_s6, 4096  ;;  %p1787_p3 = scmp.lt.s32.totalorder %s2300_s7, %s1785_s6 }
  0x81   : > { %284 = vst.msk [vmem:[#allocation2 + $0x70] sm:$0xff] %vm269_vm0, %v1875_v48  ;;  %285 = vst.msk [vmem:[#allocation2 + $0x78] sm:$0xff] %vm269_vm0, %v1875_v48  ;;  %p1783_p10 = pneg %p1782_p1  ;;  %p1788_p5 = scmp.lt.s32.totalorder %s1786_s21, %s1780_s28 }
  0x82   : > { %286 = vst.msk [vmem:[#allocation2 + $0x80] sm:$0xff] %vm269_vm0, %v1875_v48  ;;  %287 = vst.msk [vmem:[#allocation2 + $0x88] sm:$0xff] %vm269_vm0, %v1875_v48 }
  0x83   : > { %1423 = vmatpush3.bf16.msra.mxu0 %v1641_v13  ;;  %1537 = vmatpush3.bf16.msra.mxu1 %v1641_v13  ;;  %288 = vst.msk [vmem:[#allocation2 + $0x90] sm:$0xff] %vm269_vm0, %v1875_v48  ;;  %289 = vst.msk [vmem:[#allocation2 + $0x98] sm:$0xff] %vm269_vm0, %v1875_v48  ;;  %p1789_p9 = por %p1788_p5, %p1787_p3 }
  0x84   : > { %1424 = vmatprep.subr.bf16.mxu0 %v1642_v14  ;;  %1530 = vmatprep.subr.bf16.mxu1 %v1642_v14  ;;  %290 = vst.msk [vmem:[#allocation2 + $0xa0] sm:$0xff] %vm269_vm0, %v1875_v48  ;;  %291 = vst.msk [vmem:[#allocation2 + $0xa8] sm:$0xff] %vm269_vm0, %v1875_v48 }
  0x85   : > { %292 = vst.msk [vmem:[#allocation2 + $0xb0] sm:$0xff] %vm269_vm0, %v1875_v48  ;;  %293 = vst.msk [vmem:[#allocation2 + $0xb8] sm:$0xff] %vm269_vm0, %v1875_v48  ;;  %p1790_p11 = pnand %p1789_p9, %p1783_p10 }
  0x86   : > { %294 = vst.msk [vmem:[#allocation2 + $0xc0] sm:$0xff] %vm269_vm0, %v1875_v48  ;;  %295 = vst.msk [vmem:[#allocation2 + $0xc8] sm:$0xff] %vm269_vm0, %v1875_v48 }
  0x87   : > { %1425 = vmatpush3.bf16.msra.mxu0 %v1643_v15  ;;  %1538 = vmatpush3.bf16.msra.mxu1 %v1643_v15  ;;  %296 = vst.msk [vmem:[#allocation2 + $0xd0] sm:$0xff] %vm269_vm0, %v1875_v48  ;;  %297 = vst.msk [vmem:[#allocation2 + $0xd8] sm:$0xff] %vm269_vm0, %v1875_v48  ;;  %v2170_v15 = vld [vmem:[#allocation8] ss:$0 sm:$0xff] }
  0x88   : > { %1426 = vmatprep.subr.bf16.mxu0 %v1644_v16  ;;  %1531 = vmatprep.subr.bf16.mxu1 %v1644_v16  ;;  %298 = vst.msk [vmem:[#allocation2 + $0xe0] sm:$0xff] %vm269_vm0, %v1875_v48  ;;  %299 = vst.msk [vmem:[#allocation2 + $0xe8] sm:$0xff] %vm269_vm0, %v1875_v48  ;;  %v305_v16 = vld [vmem:[#allocation2 + $0x18] sm:$0xff] }
  0x89   : > { %300 = vst.msk [vmem:[#allocation2 + $0xf0] sm:$0xff] %vm269_vm0, %v1875_v48  ;;  %301 = vst.msk [vmem:[#allocation2 + $0xf8] sm:$0xff] %vm269_vm0, %v1875_v48  ;;  %v318_v53 = vld [vmem:[#allocation2 + $0x80] sm:$0xff]  ;;  %v319_v61 = vld [vmem:[#allocation2 + $0x88] sm:$0xff] }
  0x8a   : > { %v320_v9 = vld [vmem:[#allocation2 + $0x90] sm:$0xff] }
  0x8b   : > { %1427 = vmatpush3.bf16.msra.mxu0 %v1645_v17  ;;  %1539 = vmatpush3.bf16.msra.mxu1 %v1645_v17 }
  0x8e   : > { %687 = vmatmul.mubr.bf16.vlgmr.msra.gmra.mrb[0].mxu0 %v1646_v18  ;;  %751 = vmatmul.mubr.bf16.vlgmr.msra.gmra.mrb[0].mxu1 %v1649_v19  ;;  %v321_v18 = vld [vmem:[#allocation2 + $0x98] sm:$0xff] }
  0x8f   : > { %694 = vmatprep.mubr.bf16.mxu0 %v1652_v20  ;;  %758 = vmatprep.mubr.bf16.mxu1 %v1654_v21 }
  0x96   : > { %695 = vmatmul.mubr.bf16.gmra.mrb[4].mxu0 %v1656_v22  ;;  %759 = vmatmul.mubr.bf16.gmra.mrb[4].mxu1 %v1657_v23 }
  0x97   : > { %702 = vmatprep.mubr.bf16.mxu0 %v1658_v24  ;;  %766 = vmatprep.mubr.bf16.mxu1 %v1660_v25 }
  0x9e   : > { %703 = vmatmul.mubr.bf16.gmra.mrb[8].mxu0 %v1662_v26  ;;  %767 = vmatmul.mubr.bf16.gmra.mrb[8].mxu1 %v1663_v27 }
  0x9f   : > { %710 = vmatprep.mubr.bf16.mxu0 %v1664_v28  ;;  %774 = vmatprep.mubr.bf16.mxu1 %v1666_v29 }
  0xa6   : > { %711 = vmatmul.mubr.bf16.gmra.mrb[12].mxu0 %v1668_v30  ;;  %775 = vmatmul.mubr.bf16.gmra.mrb[12].mxu1 %v1669_v31 }
  0xa7   : > { %718 = vmatprep.mubr.bf16.mxu0 %v1670_v32  ;;  %782 = vmatprep.mubr.bf16.mxu1 %v1672_v33 }
  0xae   : > { %719 = vmatmul.mubr.bf16.gmra.mrb[16].mxu0 %v1674_v34  ;;  %783 = vmatmul.mubr.bf16.gmra.mrb[16].mxu1 %v1675_v35 }
  0xaf   : > { %726 = vmatprep.mubr.bf16.mxu0 %v1676_v36  ;;  %790 = vmatprep.mubr.bf16.mxu1 %v1678_v37 }
  0xb6   : > { %727 = vmatmul.mubr.bf16.gmra.mrb[20].mxu0 %v1680_v38  ;;  %791 = vmatmul.mubr.bf16.gmra.mrb[20].mxu1 %v1681_v39 }
  0xb7   : > { %734 = vmatprep.mubr.bf16.mxu0 %v1682_v40  ;;  %798 = vmatprep.mubr.bf16.mxu1 %v1684_v41 }
  0xbe   : > { %735 = vmatmul.mubr.bf16.gmra.mrb[24].mxu0 %v1686_v42  ;;  %799 = vmatmul.mubr.bf16.gmra.mrb[24].mxu1 %v1687_v43 }
  0xbf   : > { %742 = vmatprep.mubr.bf16.mxu0 %v1688_v44  ;;  %806 = vmatprep.mubr.bf16.mxu1 %v1690_v45  ;;  %v306_v44 = vld [vmem:[#allocation2 + $0x20] sm:$0xff] }
  0xc0   : > { %v322_v45 = vld [vmem:[#allocation2 + $0xa0] sm:$0xff] }
  0xc6   : > { %743 = vmatmul.mubr.bf16.gmra.mrb[28].mxu0 %v1692_v46  ;;  %807 = vmatmul.mubr.bf16.gmra.mrb[28].mxu1 %v1693_v47 }
 0x161   : > { %v1428_v49 = vpop.f32.mrb[0].mxu0  ;;  %v1476_v50 = vpop.f32.mrb[0].mxu1 }
 0x162   : > { %v1429_v52 = vpop.f32.mrb[1].mxu0  ;;  %v1477_v54 = vpop.f32.mrb[1].mxu1 }
 0x163   : > { %v1430_v55 = vadd.f32 %v1429_v52, %v1428_v49  ;;  %v1478_v56 = vadd.f32 %v1477_v54, %v1476_v50  ;;  %v1431_v57 = vpop.f32.mrb[2].mxu0  ;;  %v1479_v58 = vpop.f32.mrb[2].mxu1  ;;  %v307_v50 = vld [vmem:[#allocation2 + $0x28] sm:$0xff] }
 0x164   : > { %v1432_v60 = vpop.f32.mrb[3].mxu0  ;;  %v1480_v62 = vpop.f32.mrb[3].mxu1  ;;  %v323_v52 = vld [vmem:[#allocation2 + $0xa8] sm:$0xff] }
 0x165   : > { %v815_v63 = vadd.f32 %v1430_v55, %v302_v51  ;;  %v831_v0 = vadd.f32 %v1478_v56, %v318_v53  ;;  %v1433_v1 = vadd.f32 %v1432_v60, %v1431_v57  ;;  %v1481_v2 = vadd.f32 %v1480_v62, %v1479_v58 }
 0x167   : > { %848 = vst.msk [vmem:[#allocation2] sm:$0xff] %vm269_vm0, %v815_v63  ;;  %864 = vst.msk [vmem:[#allocation2 + $0x80] sm:$0xff] %vm269_vm0, %v831_v0  ;;  %v816_v3 = vadd.f32 %v1433_v1, %v303_v59  ;;  %v832_v4 = vadd.f32 %v1481_v2, %v319_v61 }
 0x169   : > { %849 = vst.msk [vmem:[#allocation2 + $0x8] sm:$0xff] %vm269_vm0, %v816_v3  ;;  %865 = vst.msk [vmem:[#allocation2 + $0x88] sm:$0xff] %vm269_vm0, %v832_v4  ;;  %v1434_v5 = vpop.f32.mrb[4].mxu0  ;;  %v1482_v6 = vpop.f32.mrb[4].mxu1 }
 0x16a   : > { %v1435_v8 = vpop.f32.mrb[5].mxu0  ;;  %v1483_v10 = vpop.f32.mrb[5].mxu1 }
 0x16b   : > { %v1436_v11 = vadd.f32 %v1435_v8, %v1434_v5  ;;  %v1484_v12 = vadd.f32 %v1483_v10, %v1482_v6  ;;  %v1437_v13 = vpop.f32.mrb[6].mxu0  ;;  %v1485_v14 = vpop.f32.mrb[6].mxu1 }
 0x16c   : > { %v1438_v17 = vpop.f32.mrb[7].mxu0  ;;  %v1486_v19 = vpop.f32.mrb[7].mxu1 }
 0x16d   : > { %v817_v20 = vadd.f32 %v1436_v11, %v304_v7  ;;  %v833_v21 = vadd.f32 %v1484_v12, %v320_v9  ;;  %v1439_v22 = vadd.f32 %v1438_v17, %v1437_v13  ;;  %v1487_v23 = vadd.f32 %v1486_v19, %v1485_v14  ;;  %v308_v17 = vld [vmem:[#allocation2 + $0x30] sm:$0xff] }
 0x16e   : > { %v883_v24 = vld [vmem:[#allocation2] sm:$0xff] }
 0x16f   : > { %v899_v25 = vld [vmem:[#allocation2 + $0x80] sm:$0xff]  ;;  %v922_v26 = vadd.f32 %v2170_v15, %v883_v24  ;;  %850 = vst.msk [vmem:[#allocation2 + $0x10] sm:$0xff] %vm269_vm0, %v817_v20  ;;  %866 = vst.msk [vmem:[#allocation2 + $0x90] sm:$0xff] %vm269_vm0, %v833_v21  ;;  %v818_v28 = vadd.f32 %v1439_v22, %v305_v16  ;;  %v834_v29 = vadd.f32 %v1487_v23, %v321_v18  ;;  %v324_v18 = vld [vmem:[#allocation2 + $0xb0] sm:$0xff] }
 0x170   : > { %v938_v27 = vadd.f32 %v2170_v15, %v899_v25  ;;  %v884_v30 = vld [vmem:[#allocation2 + $0x8] sm:$0xff]  ;;  %v309_v23 = vld [vmem:[#allocation2 + $0x38] sm:$0xff] }
 0x171   : > { %v900_v31 = vld [vmem:[#allocation2 + $0x88] sm:$0xff]  ;;  %v954_v32 = vmax.f32 %v922_v26, 0.0  ;;  %v923_v34 = vadd.f32 %v2170_v15, %v884_v30  ;;  %851 = vst.msk [vmem:[#allocation2 + $0x18] sm:$0xff] %vm269_vm0, %v818_v28  ;;  %867 = vst.msk [vmem:[#allocation2 + $0x98] sm:$0xff] %vm269_vm0, %v834_v29  ;;  %v1440_v36 = vpop.f32.mrb[8].mxu0  ;;  %v1488_v37 = vpop.f32.mrb[8].mxu1 }
 0x172   : > { %v970_v33 = vmax.f32 %v938_v27, 0.0  ;;  %v939_v35 = vadd.f32 %v2170_v15, %v900_v31  ;;  %v1441_v38 = vpop.f32.mrb[9].mxu0  ;;  %v1489_v39 = vpop.f32.mrb[9].mxu1  ;;  %v325_v25 = vld [vmem:[#allocation2 + $0xb8] sm:$0xff] }
 0x173   : > { %v1379_v40 = vpack.c.bf16 %v954_v32, %v954_v32  ;;  %v955_v42 = vmax.f32 %v923_v34, 0.0  ;;  %v1443_v46 = vpop.f32.mrb[10].mxu0  ;;  %v1491_v47 = vpop.f32.mrb[10].mxu1  ;;  %v1442_v48 = vadd.f32 %v1441_v38, %v1440_v36  ;;  %v1490_v49 = vadd.f32 %v1489_v39, %v1488_v37 }
 0x174   : > { %v1395_v41 = vpack.c.bf16 %v970_v33, %v970_v33  ;;  %v971_v43 = vmax.f32 %v939_v35, 0.0  ;;  %v1444_v51 = vpop.f32.mrb[11].mxu0  ;;  %v1492_v53 = vpop.f32.mrb[11].mxu1 }
 0x175   : > { %1115 = vst.msk [vmem:[%s2183_s22] sm:$0xf] %vm1114_vm1, %v1379_v40  ;;  %v1380_v54 = vpack.c.bf16 %v955_v42, %v955_v42  ;;  %v1445_v56 = vadd.f32 %v1444_v51, %v1443_v46  ;;  %v1493_v57 = vadd.f32 %v1492_v53, %v1491_v47  ;;  %v819_v60 = vadd.f32 %v1442_v48, %v306_v44  ;;  %v310_v47 = vld [vmem:[#allocation2 + $0x40] sm:$0xff] }
 0x176   : > { %1131 = vst.msk [vmem:[%s2183_s22 + $0x40] sm:$0xf] %vm1114_vm1, %v1395_v41  ;;  %v1396_v55 = vpack.c.bf16 %v971_v43, %v971_v43  ;;  %v885_v58 = vld [vmem:[#allocation2 + $0x10] sm:$0xff]  ;;  %v835_v61 = vadd.f32 %v1490_v49, %v322_v45  ;;  %v326_v49 = vld [vmem:[#allocation2 + $0xc0] sm:$0xff] }
 0x177   : > { %v901_v59 = vld [vmem:[#allocation2 + $0x90] sm:$0xff]  ;;  %1116 = vst.msk [vmem:[%s2183_s22 + $0x4] sm:$0xf] %vm1114_vm1, %v1380_v54  ;;  %v924_v62 = vadd.f32 %v2170_v15, %v885_v58  ;;  %v820_v0 = vadd.f32 %v1445_v56, %v307_v50  ;;  %v836_v1 = vadd.f32 %v1493_v57, %v323_v52 }
 0x178   : > { %1132 = vst.msk [vmem:[%s2183_s22 + $0x44] sm:$0xf] %vm1114_vm1, %v1396_v55  ;;  %v940_v63 = vadd.f32 %v2170_v15, %v901_v59  ;;  %v886_v2 = vld [vmem:[#allocation2 + $0x18] sm:$0xff] }
 0x179   : > { %v902_v3 = vld [vmem:[#allocation2 + $0x98] sm:$0xff]  ;;  %852 = vst.msk [vmem:[#allocation2 + $0x20] sm:$0xff] %vm269_vm0, %v819_v60  ;;  %868 = vst.msk [vmem:[#allocation2 + $0xa0] sm:$0xff] %vm269_vm0, %v835_v61  ;;  %v956_v4 = vmax.f32 %v924_v62, 0.0  ;;  %v925_v6 = vadd.f32 %v2170_v15, %v886_v2  ;;  %v1446_v8 = vpop.f32.mrb[12].mxu0  ;;  %v1494_v9 = vpop.f32.mrb[12].mxu1 }
 0x17a   : > { %v972_v5 = vmax.f32 %v940_v63, 0.0  ;;  %v941_v7 = vadd.f32 %v2170_v15, %v902_v3  ;;  %853 = vst.msk [vmem:[#allocation2 + $0x28] sm:$0xff] %vm269_vm0, %v820_v0  ;;  %869 = vst.msk [vmem:[#allocation2 + $0xa8] sm:$0xff] %vm269_vm0, %v836_v1  ;;  %v1447_v10 = vpop.f32.mrb[13].mxu0  ;;  %v1495_v11 = vpop.f32.mrb[13].mxu1  ;;  %v311_v1 = vld [vmem:[#allocation2 + $0x48] sm:$0xff] }
 0x17b   : > { %v1381_v12 = vpack.c.bf16 %v956_v4, %v956_v4  ;;  %v957_v14 = vmax.f32 %v925_v6, 0.0  ;;  %v1449_v19 = vpop.f32.mrb[14].mxu0  ;;  %v1497_v20 = vpop.f32.mrb[14].mxu1  ;;  %v1448_v21 = vadd.f32 %v1447_v10, %v1446_v8  ;;  %v1496_v22 = vadd.f32 %v1495_v11, %v1494_v9  ;;  %v327_v2 = vld [vmem:[#allocation2 + $0xc8] sm:$0xff] }
 0x17c   : > { %v1397_v13 = vpack.c.bf16 %v972_v5, %v972_v5  ;;  %v973_v16 = vmax.f32 %v941_v7, 0.0  ;;  %v1450_v24 = vpop.f32.mrb[15].mxu0  ;;  %v1498_v26 = vpop.f32.mrb[15].mxu1 }
 0x17d   : > { %1117 = vst.msk [vmem:[%s2183_s22 + $0x8] sm:$0xf] %vm1114_vm1, %v1381_v12  ;;  %v1382_v27 = vpack.c.bf16 %v957_v14, %v957_v14  ;;  %v1451_v29 = vadd.f32 %v1450_v24, %v1449_v19  ;;  %v1499_v30 = vadd.f32 %v1498_v26, %v1497_v20  ;;  %v821_v31 = vadd.f32 %v1448_v21, %v308_v17  ;;  %v312_v20 = vld [vmem:[#allocation2 + $0x50] sm:$0xff] }
 0x17e   : > { %1133 = vst.msk [vmem:[%s2183_s22 + $0x48] sm:$0xf] %vm1114_vm1, %v1397_v13  ;;  %v1398_v28 = vpack.c.bf16 %v973_v16, %v973_v16  ;;  %v837_v32 = vadd.f32 %v1496_v22, %v324_v18  ;;  %v328_v22 = vld [vmem:[#allocation2 + $0xd0] sm:$0xff] }
 0x17f   : > { %1118 = vst.msk [vmem:[%s2183_s22 + $0xc] sm:$0xf] %vm1114_vm1, %v1382_v27  ;;  %v822_v35 = vadd.f32 %v1451_v29, %v309_v23  ;;  %v838_v36 = vadd.f32 %v1499_v30, %v325_v25 }
 0x180   : > { %1134 = vst.msk [vmem:[%s2183_s22 + $0x4c] sm:$0xf] %vm1114_vm1, %v1398_v28  ;;  %v887_v33 = vld [vmem:[#allocation2 + $0x20] sm:$0xff] }
 0x181   : > { %v903_v34 = vld [vmem:[#allocation2 + $0xa0] sm:$0xff]  ;;  %v926_v37 = vadd.f32 %v2170_v15, %v887_v33  ;;  %v888_v39 = vld [vmem:[#allocation2 + $0x28] sm:$0xff]  ;;  %854 = vst.msk [vmem:[#allocation2 + $0x30] sm:$0xff] %vm269_vm0, %v821_v31  ;;  %870 = vst.msk [vmem:[#allocation2 + $0xb0] sm:$0xff] %vm269_vm0, %v837_v32  ;;  %v1452_v43 = vpop.f32.mrb[16].mxu0  ;;  %v1500_v44 = vpop.f32.mrb[16].mxu1 }
 0x182   : > { %v942_v38 = vadd.f32 %v2170_v15, %v903_v34  ;;  %v904_v40 = vld [vmem:[#allocation2 + $0xa8] sm:$0xff]  ;;  %v927_v41 = vadd.f32 %v2170_v15, %v888_v39  ;;  %855 = vst.msk [vmem:[#allocation2 + $0x38] sm:$0xff] %vm269_vm0, %v822_v35  ;;  %871 = vst.msk [vmem:[#allocation2 + $0xb8] sm:$0xff] %vm269_vm0, %v838_v36  ;;  %v1453_v48 = vpop.f32.mrb[17].mxu0  ;;  %v1501_v50 = vpop.f32.mrb[17].mxu1  ;;  %v329_v39 = vld [vmem:[#allocation2 + $0xd8] sm:$0xff] }
 0x183   : > { %v943_v42 = vadd.f32 %v2170_v15, %v904_v40  ;;  %v958_v45 = vmax.f32 %v926_v37, 0.0  ;;  %v1454_v53 = vadd.f32 %v1453_v48, %v1452_v43  ;;  %v1502_v54 = vadd.f32 %v1501_v50, %v1500_v44  ;;  %v1455_v55 = vpop.f32.mrb[18].mxu0  ;;  %v1503_v56 = vpop.f32.mrb[18].mxu1 }
 0x184   : > { %v974_v46 = vmax.f32 %v942_v38, 0.0  ;;  %v959_v51 = vmax.f32 %v927_v41, 0.0  ;;  %v1456_v59 = vpop.f32.mrb[19].mxu0  ;;  %v1504_v60 = vpop.f32.mrb[19].mxu1  ;;  %v313_v38 = vld [vmem:[#allocation2 + $0x58] sm:$0xff] }
 0x185   : > { %v975_v52 = vmax.f32 %v943_v42, 0.0  ;;  %v1383_v57 = vpack.c.bf16 %v958_v45, %v958_v45  ;;  %v823_v63 = vadd.f32 %v1454_v53, %v310_v47  ;;  %v839_v0 = vadd.f32 %v1502_v54, %v326_v49 }
 0x186   : > { %v1399_v58 = vpack.c.bf16 %v974_v46, %v974_v46  ;;  %v1384_v61 = vpack.c.bf16 %v959_v51, %v959_v51  ;;  %v1457_v3 = vadd.f32 %v1456_v59, %v1455_v55  ;;  %v1505_v4 = vadd.f32 %v1504_v60, %v1503_v56  ;;  %v314_v56 = vld [vmem:[#allocation2 + $0x60] sm:$0xff] }
 0x187   : > { %v1400_v62 = vpack.c.bf16 %v975_v52, %v975_v52  ;;  %1119 = vst.msk [vmem:[%s2183_s22 + $0x10] sm:$0xf] %vm1114_vm1, %v1383_v57 }
 0x188   : > { %1135 = vst.msk [vmem:[%s2183_s22 + $0x50] sm:$0xf] %vm1114_vm1, %v1399_v58  ;;  %1120 = vst.msk [vmem:[%s2183_s22 + $0x14] sm:$0xf] %vm1114_vm1, %v1384_v61  ;;  %v889_v5 = vld [vmem:[#allocation2 + $0x30] sm:$0xff]  ;;  %v824_v11 = vadd.f32 %v1457_v3, %v311_v1  ;;  %v840_v12 = vadd.f32 %v1505_v4, %v327_v2  ;;  %v330_v58 = vld [vmem:[#allocation2 + $0xe0] sm:$0xff] }
 0x189   : > { %1136 = vst.msk [vmem:[%s2183_s22 + $0x54] sm:$0xf] %vm1114_vm1, %v1400_v62  ;;  %v905_v6 = vld [vmem:[#allocation2 + $0xb0] sm:$0xff]  ;;  %v928_v7 = vadd.f32 %v2170_v15, %v889_v5  ;;  %v890_v9 = vld [vmem:[#allocation2 + $0x38] sm:$0xff]  ;;  %v1458_v16 = vpop.f32.mrb[20].mxu0  ;;  %v1506_v17 = vpop.f32.mrb[20].mxu1 }
 0x18a   : > { %856 = vst.msk [vmem:[#allocation2 + $0x40] sm:$0xff] %vm269_vm0, %v823_v63  ;;  %872 = vst.msk [vmem:[#allocation2 + $0xc0] sm:$0xff] %vm269_vm0, %v839_v0  ;;  %v944_v8 = vadd.f32 %v2170_v15, %v905_v6  ;;  %v906_v10 = vld [vmem:[#allocation2 + $0xb8] sm:$0xff]  ;;  %v929_v13 = vadd.f32 %v2170_v15, %v890_v9  ;;  %v1459_v21 = vpop.f32.mrb[21].mxu0  ;;  %v1507_v23 = vpop.f32.mrb[21].mxu1  ;;  %v315_v4 = vld [vmem:[#allocation2 + $0x68] sm:$0xff] }
 0x18b   : > { %v945_v14 = vadd.f32 %v2170_v15, %v906_v10  ;;  %v960_v18 = vmax.f32 %v928_v7, 0.0  ;;  %857 = vst.msk [vmem:[#allocation2 + $0x48] sm:$0xff] %vm269_vm0, %v824_v11  ;;  %873 = vst.msk [vmem:[#allocation2 + $0xc8] sm:$0xff] %vm269_vm0, %v840_v12  ;;  %v1460_v26 = vadd.f32 %v1459_v21, %v1458_v16  ;;  %v1508_v27 = vadd.f32 %v1507_v23, %v1506_v17  ;;  %v1461_v28 = vpop.f32.mrb[22].mxu0  ;;  %v1509_v29 = vpop.f32.mrb[22].mxu1  ;;  %v331_v6 = vld [vmem:[#allocation2 + $0xe8] sm:$0xff] }
 0x18c   : > { %v976_v19 = vmax.f32 %v944_v8, 0.0  ;;  %v961_v24 = vmax.f32 %v929_v13, 0.0  ;;  %v1462_v32 = vpop.f32.mrb[23].mxu0  ;;  %v1510_v33 = vpop.f32.mrb[23].mxu1 }
 0x18d   : > { %v977_v25 = vmax.f32 %v945_v14, 0.0  ;;  %v1385_v30 = vpack.c.bf16 %v960_v18, %v960_v18  ;;  %v825_v36 = vadd.f32 %v1460_v26, %v312_v20  ;;  %v841_v37 = vadd.f32 %v1508_v27, %v328_v22 }
 0x18e   : > { %v1401_v31 = vpack.c.bf16 %v976_v19, %v976_v19  ;;  %v1386_v34 = vpack.c.bf16 %v961_v24, %v961_v24  ;;  %v1463_v42 = vadd.f32 %v1462_v32, %v1461_v28  ;;  %v1511_v43 = vadd.f32 %v1510_v33, %v1509_v29  ;;  %v316_v29 = vld [vmem:[#allocation2 + $0x70] sm:$0xff] }
 0x18f   : > { %v1402_v35 = vpack.c.bf16 %v977_v25, %v977_v25  ;;  %1121 = vst.msk [vmem:[%s2183_s22 + $0x18] sm:$0xf] %vm1114_vm1, %v1385_v30 }
 0x190   : > { %1137 = vst.msk [vmem:[%s2183_s22 + $0x58] sm:$0xf] %vm1114_vm1, %v1401_v31  ;;  %1122 = vst.msk [vmem:[%s2183_s22 + $0x1c] sm:$0xf] %vm1114_vm1, %v1386_v34  ;;  %v826_v46 = vadd.f32 %v1463_v42, %v313_v38  ;;  %v842_v47 = vadd.f32 %v1511_v43, %v329_v39  ;;  %v332_v31 = vld [vmem:[#allocation2 + $0xf0] sm:$0xff]  ;;  %v333_v43 = vld [vmem:[#allocation2 + $0xf8] sm:$0xff] }
 0x191   : > { %v891_v40 = vld [vmem:[#allocation2 + $0x40] sm:$0xff]  ;;  %1138 = vst.msk [vmem:[%s2183_s22 + $0x5c] sm:$0xf] %vm1114_vm1, %v1402_v35  ;;  %v1464_v52 = vpop.f32.mrb[24].mxu0  ;;  %v1512_v53 = vpop.f32.mrb[24].mxu1 }
 0x192   : > { %v907_v41 = vld [vmem:[#allocation2 + $0xc0] sm:$0xff]  ;;  %v930_v44 = vadd.f32 %v2170_v15, %v891_v40  ;;  %858 = vst.msk [vmem:[#allocation2 + $0x50] sm:$0xff] %vm269_vm0, %v825_v36  ;;  %874 = vst.msk [vmem:[#allocation2 + $0xd0] sm:$0xff] %vm269_vm0, %v841_v37  ;;  %v892_v50 = vld [vmem:[#allocation2 + $0x48] sm:$0xff]  ;;  %v1465_v57 = vpop.f32.mrb[25].mxu0  ;;  %v1513_v59 = vpop.f32.mrb[25].mxu1 }
 0x193   : > { %v946_v45 = vadd.f32 %v2170_v15, %v907_v41  ;;  %v908_v51 = vld [vmem:[#allocation2 + $0xc8] sm:$0xff]  ;;  %v931_v54 = vadd.f32 %v2170_v15, %v892_v50  ;;  %859 = vst.msk [vmem:[#allocation2 + $0x58] sm:$0xff] %vm269_vm0, %v826_v46  ;;  %875 = vst.msk [vmem:[#allocation2 + $0xd8] sm:$0xff] %vm269_vm0, %v842_v47  ;;  %v1466_v62 = vadd.f32 %v1465_v57, %v1464_v52  ;;  %v1467_v0 = vpop.f32.mrb[26].mxu0  ;;  %v1515_v1 = vpop.f32.mrb[26].mxu1  ;;  %v317_v41 = vld [vmem:[#allocation2 + $0x78] sm:$0xff] }
 0x194   : > { %v962_v48 = vmax.f32 %v930_v44, 0.0  ;;  %v947_v55 = vadd.f32 %v2170_v15, %v908_v51  ;;  %v1514_v63 = vadd.f32 %v1513_v59, %v1512_v53  ;;  %v1468_v5 = vpop.f32.mrb[27].mxu0  ;;  %v1516_v7 = vpop.f32.mrb[27].mxu1 }
 0x195   : > { %v978_v49 = vmax.f32 %v946_v45, 0.0  ;;  %v963_v2 = vmax.f32 %v931_v54, 0.0  ;;  %v827_v8 = vadd.f32 %v1466_v62, %v314_v56  ;;  %v1469_v10 = vadd.f32 %v1468_v5, %v1467_v0 }
 0x196   : > { %v1387_v60 = vpack.c.bf16 %v962_v48, %v962_v48  ;;  %v979_v3 = vmax.f32 %v947_v55, 0.0  ;;  %v843_v9 = vadd.f32 %v1514_v63, %v330_v58  ;;  %v1517_v11 = vadd.f32 %v1516_v7, %v1515_v1 }
 0x197   : > { %v1403_v61 = vpack.c.bf16 %v978_v49, %v978_v49  ;;  %v1388_v12 = vpack.c.bf16 %v963_v2, %v963_v2  ;;  %860 = vst.msk [vmem:[#allocation2 + $0x60] sm:$0xff] %vm269_vm0, %v827_v8  ;;  %v828_v19 = vadd.f32 %v1469_v10, %v315_v4 }
 0x198   : > { %1123 = vst.msk [vmem:[%s2183_s22 + $0x20] sm:$0xf] %vm1114_vm1, %v1387_v60  ;;  %v1404_v13 = vpack.c.bf16 %v979_v3, %v979_v3  ;;  %v844_v20 = vadd.f32 %v1517_v11, %v331_v6 }
 0x199   : > { %1139 = vst.msk [vmem:[%s2183_s22 + $0x60] sm:$0xf] %vm1114_vm1, %v1403_v61  ;;  %v893_v14 = vld [vmem:[#allocation2 + $0x50] sm:$0xff]  ;;  %1124 = vst.msk [vmem:[%s2183_s22 + $0x24] sm:$0xf] %vm1114_vm1, %v1388_v12  ;;  %v1470_v25 = vpop.f32.mrb[28].mxu0 }
 0x19a   : > { %v909_v16 = vld [vmem:[#allocation2 + $0xd0] sm:$0xff]  ;;  %v932_v17 = vadd.f32 %v2170_v15, %v893_v14  ;;  %876 = vst.msk [vmem:[#allocation2 + $0xe0] sm:$0xff] %vm269_vm0, %v843_v9  ;;  %v894_v23 = vld [vmem:[#allocation2 + $0x58] sm:$0xff]  ;;  %861 = vst.msk [vmem:[#allocation2 + $0x68] sm:$0xff] %vm269_vm0, %v828_v19  ;;  %v1518_v26 = vpop.f32.mrb[28].mxu1  ;;  %v1471_v30 = vpop.f32.mrb[29].mxu0 }
 0x19b   : > { %v948_v18 = vadd.f32 %v2170_v15, %v909_v16  ;;  %1140 = vst.msk [vmem:[%s2183_s22 + $0x64] sm:$0xf] %vm1114_vm1, %v1404_v13  ;;  %v910_v24 = vld [vmem:[#allocation2 + $0xd8] sm:$0xff]  ;;  %v933_v27 = vadd.f32 %v2170_v15, %v894_v23  ;;  %v1519_v32 = vpop.f32.mrb[29].mxu1  ;;  %v1472_v35 = vadd.f32 %v1471_v30, %v1470_v25  ;;  %v1473_v37 = vpop.f32.mrb[30].mxu0 }
 0x19c   : > { %v964_v21 = vmax.f32 %v932_v17, 0.0  ;;  %877 = vst.msk [vmem:[#allocation2 + $0xe8] sm:$0xff] %vm269_vm0, %v844_v20  ;;  %v949_v28 = vadd.f32 %v2170_v15, %v910_v24  ;;  %v1520_v36 = vadd.f32 %v1519_v32, %v1518_v26  ;;  %v1521_v38 = vpop.f32.mrb[30].mxu1  ;;  %v1474_v42 = vpop.f32.mrb[31].mxu0 }
 0x19d   : > { %v980_v22 = vmax.f32 %v948_v18, 0.0  ;;  %v965_v39 = vmax.f32 %v933_v27, 0.0  ;;  %v1522_v44 = vpop.f32.mrb[31].mxu1  ;;  %v829_v45 = vadd.f32 %v1472_v35, %v316_v29  ;;  %v1475_v47 = vadd.f32 %v1474_v42, %v1473_v37 }
 0x19e   : > { %v1389_v33 = vpack.c.bf16 %v964_v21, %v964_v21  ;;  %v981_v40 = vmax.f32 %v949_v28, 0.0  ;;  %v845_v46 = vadd.f32 %v1520_v36, %v332_v31  ;;  %v1523_v48 = vadd.f32 %v1522_v44, %v1521_v38  ;;  %v895_v51 = vld [vmem:[#allocation2 + $0x60] sm:$0xff] }
 0x19f   : > { %v1405_v34 = vpack.c.bf16 %v980_v22, %v980_v22  ;;  %v1390_v49 = vpack.c.bf16 %v965_v39, %v965_v39  ;;  %v934_v53 = vadd.f32 %v2170_v15, %v895_v51  ;;  %862 = vst.msk [vmem:[#allocation2 + $0x70] sm:$0xff] %vm269_vm0, %v829_v45  ;;  %v830_v55 = vadd.f32 %v1475_v47, %v317_v41 }
 0x1a0   : > { %1125 = vst.msk [vmem:[%s2183_s22 + $0x28] sm:$0xf] %vm1114_vm1, %v1389_v33  ;;  %v1406_v50 = vpack.c.bf16 %v981_v40, %v981_v40  ;;  %v846_v56 = vadd.f32 %v1523_v48, %v333_v43 }
 0x1a1   : > { %1141 = vst.msk [vmem:[%s2183_s22 + $0x68] sm:$0xf] %vm1114_vm1, %v1405_v34  ;;  %v911_v52 = vld [vmem:[#allocation2 + $0xe0] sm:$0xff]  ;;  %1126 = vst.msk [vmem:[%s2183_s22 + $0x2c] sm:$0xf] %vm1114_vm1, %v1390_v49  ;;  %v896_v57 = vld [vmem:[#allocation2 + $0x68] sm:$0xff] }
 0x1a2   : > { %v950_v54 = vadd.f32 %v2170_v15, %v911_v52  ;;  %878 = vst.msk [vmem:[#allocation2 + $0xf0] sm:$0xff] %vm269_vm0, %v845_v46  ;;  %v966_v59 = vmax.f32 %v934_v53, 0.0  ;;  %v935_v61 = vadd.f32 %v2170_v15, %v896_v57  ;;  %863 = vst.msk [vmem:[#allocation2 + $0x78] sm:$0xff] %vm269_vm0, %v830_v55 }
 0x1a3   : > { %1142 = vst.msk [vmem:[%s2183_s22 + $0x6c] sm:$0xf] %vm1114_vm1, %v1406_v50  ;;  %v912_v58 = vld [vmem:[#allocation2 + $0xe8] sm:$0xff] }
 0x1a4   : > { %v982_v60 = vmax.f32 %v950_v54, 0.0  ;;  %v951_v62 = vadd.f32 %v2170_v15, %v912_v58  ;;  %879 = vst.msk [vmem:[#allocation2 + $0xf8] sm:$0xff] %vm269_vm0, %v846_v56  ;;  %v1391_v63 = vpack.c.bf16 %v966_v59, %v966_v59  ;;  %v967_v1 = vmax.f32 %v935_v61, 0.0 }
 0x1a6   : > { %v1407_v0 = vpack.c.bf16 %v982_v60, %v982_v60  ;;  %v983_v2 = vmax.f32 %v951_v62, 0.0  ;;  %1127 = vst.msk [vmem:[%s2183_s22 + $0x30] sm:$0xf] %vm1114_vm1, %v1391_v63  ;;  %v1392_v3 = vpack.c.bf16 %v967_v1, %v967_v1  ;;  %v897_v5 = vld [vmem:[#allocation2 + $0x70] sm:$0xff] }
 0x1a7   : > { %v936_v7 = vadd.f32 %v2170_v15, %v897_v5 }
 0x1a8   : > { %1143 = vst.msk [vmem:[%s2183_s22 + $0x70] sm:$0xf] %vm1114_vm1, %v1407_v0  ;;  %v1408_v4 = vpack.c.bf16 %v983_v2, %v983_v2  ;;  %1128 = vst.msk [vmem:[%s2183_s22 + $0x34] sm:$0xf] %vm1114_vm1, %v1392_v3 }
 0x1a9   : > { %v913_v6 = vld [vmem:[#allocation2 + $0xf0] sm:$0xff]  ;;  %v898_v9 = vld [vmem:[#allocation2 + $0x78] sm:$0xff]  ;;  %v968_v11 = vmax.f32 %v936_v7, 0.0 }
 0x1aa   : > { %1144 = vst.msk [vmem:[%s2183_s22 + $0x74] sm:$0xf] %vm1114_vm1, %v1408_v4  ;;  %v952_v8 = vadd.f32 %v2170_v15, %v913_v6  ;;  %v937_v13 = vadd.f32 %v2170_v15, %v898_v9 }
 0x1ab   : > { %v914_v10 = vld [vmem:[#allocation2 + $0xf8] sm:$0xff]  ;;  %v1393_v16 = vpack.c.bf16 %v968_v11, %v968_v11 }
 0x1ac   : > { %v984_v12 = vmax.f32 %v952_v8, 0.0  ;;  %v953_v14 = vadd.f32 %v2170_v15, %v914_v10  ;;  %v969_v18 = vmax.f32 %v937_v13, 0.0 }
 0x1ad   : > { %1129 = vst.msk [vmem:[%s2183_s22 + $0x38] sm:$0xf] %vm1114_vm1, %v1393_v16 }
 0x1ae   : > { %v1409_v17 = vpack.c.bf16 %v984_v12, %v984_v12  ;;  %v985_v19 = vmax.f32 %v953_v14, 0.0  ;;  %v1394_v15 = vpack.c.bf16 %v969_v18, %v969_v18 }
 0x1b0   : > { %1145 = vst.msk [vmem:[%s2183_s22 + $0x78] sm:$0xf] %vm1114_vm1, %v1409_v17  ;;  %v1410_v20 = vpack.c.bf16 %v985_v19, %v985_v19  ;;  %1130 = vst.msk [vmem:[%s2183_s22 + $0x3c] sm:$0xf] %vm1114_vm1, %v1394_v15 }
 0x1b2   : > { %1146 = vst.msk [vmem:[%s2183_s22 + $0x7c] sm:$0xf] %vm1114_vm1, %v1410_v20 }
 0x1b3   : > { %1793 = shalt.err (!%p1790_p11)
}
 0x1b4   : > { %s1794_s10 = scalar_lea.hbm %s2298_s9, 2048  ;;  %s1798_s29 = scalar_lea.hbm %s2360_s3, 4096 }
 0x1b5   : > { %p1795_p0 = scmp.ne.s32.totalorder %s2298_s9, %s1794_s10  ;;  %p1799_p6 = scmp.lt.u32.totalorder %s2298_s9, %s2360_s3 }
 0x1b6   : > { %p1800_p7 = scmp.lt.u32.totalorder %s1798_s29, %s1794_s10  ;;  %p1802_p8 = scmp.lt.u32.totalorder %s1794_s10, %s2298_s9 }
 0x1b7   : > { %p1796_p4 = pnand %p1795_p0, %p2375_p12 }
 0x1b8   : > { %p1801_p2 = por %p1800_p7, %p1799_p6 }
 0x1b9   : > { %p1797_p13 = pneg %p1796_p4 }
 0x1ba   : > { %p1803_p1 = por %p1802_p8, %p1801_p2 }
 0x1bc   : > { %p1804_p10 = pnand %p1803_p1, %p1797_p13 }
 0x1be   : > { %1807 = shalt.err (!%p1804_p10)
}
 0x1bf   : > { %s1877_s22 = smov 64   ;;  %s1878_s24 = smov 4  }
 0x1c0   : > { %1550 = dma.vmem_to_hbm [thread:$0]  (%p2375_p12), %s2300_s7, 2048, %s2298_s9, %s1148_s15, %s1877_s22, %s1877_s22, %s1878_s24  }
 0x1c1 PF: > { %s1177_s8 = sand.u32 1, %s1846_s12   ;;  %p2376_p3 = scmp.ne.s32.totalorder %s2368_s23, 0 }
 0x1c2   : > { %p2377_p5 = scmp.ge.s32.totalorder %s1866_s17, 2  ;;  %s1178_s26 = scalar_lea.sflag [#allocation5], %s1177_s8 }
 0x1c4   : > { %p1564_p9 = pnand %p2377_p5, %p2376_p3 }
 0x1c6   : > { %1841 = dma.done.wait (!%p1564_p9), %s1178_s26, 2048  }
 0x1c7   : > { %1843 = vsyncadd (!%p1564_p9), %s1178_s26, 4294965248  ;;  %s20_s17 = sadd.s32 1, %s1866_s17   ;;  %s2378_s12 = smov %s1850_s13 }
 0x1c8   : > { %p17_p11 = scmp.ge.s32.totalorder %s20_s17, 4   ;;  %s2379_s13 = smov %s1854_s14 }
 0x1c9   : > { %s2380_s14 = smov %s2042_s4  ;;  %s2381_s15 = smov %s1862_s16 }
 0x1ca   : > { %s2382_s16 = smov %s2384_s18  ;;  %19 = sbr.rel (!%p17_p11) target bundleno = 7 (0x7), region = 95 }
 0x1d1   :  { %1183 = vsyncpa [#allocation4], 1 }
 0x1d2   :  { %1185 = vsyncpa [#allocation4 + $0x1], 1 }
 0x1d3   :  { %1186 = vsyncpa [#allocation7], 1 }
 0x1d4   :  { %1187 = vsyncpa [#allocation5], 1 }
 0x1d5   :  { %1189 = vsyncpa [#allocation5 + $0x1], 1 }

</bundles_post_ra>
